<compile_context>
chip_gen: v7x
topology: tpu7x:2x2x1
jax: 0.10.0
libtpu: 0.0.40
codegen_flags: <defaults>
</compile_context>

<pallas_src>
import functools

import jax
import jax.numpy as jnp
from jax.experimental import pallas as pl
from jax.experimental.pallas import tpu as pltpu


def _round_up(n, m):
    return ((n + m - 1) // m) * m


def net1_kernel(x_ref, w1_ref, b1_ref, w2_ref, b2_ref, out_ref):
    n_out = out_ref.shape[1]
    # Layer 1: (TB, F) @ (F, HP) -> f32 accumulate on the MXU; bias + ReLU on the VPU.
    h = jnp.dot(x_ref[...], w1_ref[...], preferred_element_type=jnp.float32)
    h = jnp.maximum(h + b1_ref[...], 0.0)                    # (TB, HP) f32
    # Layer 2: (TB, HP) @ (HP, OP) on the MXU (lane-padded for native shapes),
    # then store only the real output columns (narrow masked store << padded DMA).
    o = jnp.dot(h, w2_ref[...], preferred_element_type=jnp.float32)
    out_ref[...] = o[:, :n_out] + b2_ref[...]                # (TB, n_out) f32


@functools.partial(jax.jit, static_argnames=("tb",))
def net1_forward(x, w1, b1, w2, b2, *, tb=2048):
    """x: (B, F) f32; w1: (F, H); b1: (1, H); w2: (H, O); b2: (1, O). Returns (B, O) f32."""
    B, F = x.shape
    H = w1.shape[1]
    n_out = w2.shape[1]

    # Lane-pad the hidden/output dims of the *resident* weights only (no HBM cost
    # beyond a few KiB of zero weights; padded hidden units stay exactly zero).
    HP = _round_up(H, 128)
    OP = _round_up(n_out, 128)

    # Batch tile: big (amortizes per-grid-step overhead), a multiple of 16
    # (native sublane tiles), capped at ~ceil(B/2) so the "parallel" grid has
    # at least 2 steps for v7x's two TensorCores.
    half = _round_up(max(-(-B // 2), 16), 16)
    TB = min(tb, half)
    B_pad = _round_up(B, TB)

    # NOTE: no dtype cast of x in the wrapper (that would add a full extra HBM
    # pass); only zero-pad the batch to a multiple of TB. Padded rows are
    # sliced off at the end (row slice only -- no lane slice needed).
    x_p = jnp.pad(x, ((0, B_pad - B), (0, 0)))
    w1_p = jnp.pad(w1, ((0, 0), (0, HP - H)))
    b1_p = jnp.pad(b1, ((0, 0), (0, HP - H)))
    w2_p = jnp.pad(w2, ((0, HP - H), (0, OP - n_out)))
    # b2 stays un-padded; it is added after the in-kernel output slice.

    cost = pl.CostEstimate(
        flops=2 * B_pad * (F * HP + HP * OP),
        transcendentals=0,
        bytes_accessed=(x_p.size + B_pad * n_out + w1_p.size + b1_p.size
                        + w2_p.size + b2.size) * 4,
    )

    out = pl.pallas_call(
        net1_kernel,
        out_shape=jax.ShapeDtypeStruct((B_pad, n_out), jnp.float32),
        grid=(B_pad // TB,),
        in_specs=[
            pl.BlockSpec((TB, F), lambda i: (i, 0)),      # streamed batch tiles
            pl.BlockSpec((F, HP), lambda i: (0, 0)),      # resident weights / biases
            pl.BlockSpec((1, HP), lambda i: (0, 0)),
            pl.BlockSpec((HP, OP), lambda i: (0, 0)),
            pl.BlockSpec((1, n_out), lambda i: (0, 0)),
        ],
        out_specs=pl.BlockSpec((TB, n_out), lambda i: (i, 0)),
        compiler_params=pltpu.CompilerParams(
            dimension_semantics=("parallel",),            # v7x: shard grid over 2 TCs
            vmem_limit_bytes=32 * 1024 * 1024,            # safe on v5e/v6e/v7x
        ),
        cost_estimate=cost,
    )(x_p, w1_p, b1_p, w2_p, b2)

    return out[:B]


def init_params(key, n_feature, n_hidden=50, n_output=2):
    # Mimics PyTorch Linear's U(-1/sqrt(fan_in), 1/sqrt(fan_in)) init.
    k1, k2, k3, k4 = jax.random.split(key, 4)
    lim1 = 1.0 / jnp.sqrt(n_feature)
    lim2 = 1.0 / jnp.sqrt(n_hidden)
    w1 = jax.random.uniform(k1, (n_feature, n_hidden), jnp.float32, -lim1, lim1)
    b1 = jax.random.uniform(k2, (1, n_hidden), jnp.float32, -lim1, lim1)
    w2 = jax.random.uniform(k3, (n_hidden, n_output), jnp.float32, -lim2, lim2)
    b2 = jax.random.uniform(k4, (1, n_output), jnp.float32, -lim2, lim2)
    return w1, b1, w2, b2


if __name__ == "__main__":
    key = jax.random.PRNGKey(0)
    kx, kp = jax.random.split(key)

    n_feature = 30   # len(feature) in the original script
    n_hidden = 50
    n_output = 2
    batch = 451      # matches clean451.csv row count; exercises tiling + padding

    x = jax.random.normal(kx, (batch, n_feature), jnp.float32)
    w1, b1, w2, b2 = init_params(kp, n_feature, n_hidden, n_output)

    # With batch=451: TB=240, padded batch 480 -> 2 pipelined grid steps.
    out = net1_forward(x, w1, b1, w2, b2)
    out = jax.block_until_ready(out)
    assert out.shape == (batch, n_output)

    # f32 reference mirroring the PyTorch forward; tolerance covers any
    # difference in MXU f32-matmul pass decomposition vs XLA's default.
    ref = jnp.maximum(x @ w1 + b1, 0.0) @ w2 + b2
    err = float(jnp.max(jnp.abs(out - ref)))
    assert err < 5e-2, f"max abs error vs f32 reference: {err}"

    print("KERNEL_OK")
</pallas_src>

<mosaic_0001>
module attributes {stable_mosaic.version = 11 : i64} {
  func.func @net1_kernel(%arg0: i32, %arg1: memref<240x30xf32, #tpu.memory_space<vmem>>, %arg2: memref<30x128xf32, #tpu.memory_space<vmem>>, %arg3: memref<1x128xf32, #tpu.memory_space<vmem>>, %arg4: memref<128x128xf32, #tpu.memory_space<vmem>>, %arg5: memref<1x2xf32, #tpu.memory_space<vmem>>, %arg6: memref<240x2xf32, #tpu.memory_space<vmem>>) attributes {dimension_semantics = [#tpu.dimension_semantics<parallel>], iteration_bounds = array<i64: 2>, scalar_prefetch = 0 : i64, scratch_operands = 0 : i64, tpu.core_type = #tpu.core_type<tc>, window_params = [{transform_indices = @transform_0, window_bounds = array<i64: 240, 30>}, {pipeline_mode = #tpu.pipeline_mode<synchronous>, transform_indices = @transform_1, window_bounds = array<i64: 30, 128>}, {pipeline_mode = #tpu.pipeline_mode<synchronous>, transform_indices = @transform_2, window_bounds = array<i64: 1, 128>}, {pipeline_mode = #tpu.pipeline_mode<synchronous>, transform_indices = @transform_3, window_bounds = array<i64: 128, 128>}, {pipeline_mode = #tpu.pipeline_mode<synchronous>, transform_indices = @transform_4, window_bounds = array<i64: 1, 2>}, {transform_indices = @transform_5, window_bounds = array<i64: 240, 2>}]} {
    %c0 = arith.constant 0 : index
    %c0_0 = arith.constant 0 : index
    %0 = vector.load %arg1[%c0, %c0_0] : memref<240x30xf32, #tpu.memory_space<vmem>>, vector<240x30xf32>
    %c0_1 = arith.constant 0 : index
    %c0_2 = arith.constant 0 : index
    %1 = vector.load %arg2[%c0_1, %c0_2] : memref<30x128xf32, #tpu.memory_space<vmem>>, vector<30x128xf32>
    %cst = arith.constant dense<0.000000e+00> : vector<240x128xf32>
    %2 = tpu.matmul %0, %1, %cst {dimension_numbers = #tpu.dot_dimension_numbers<[1], [0], [0], [1], [0, 0, 1, 1], [], []>} : vector<240x30xf32>, vector<30x128xf32>, vector<240x128xf32> -> vector<240x128xf32>
    %c0_3 = arith.constant 0 : index
    %c0_4 = arith.constant 0 : index
    %3 = vector.load %arg3[%c0_3, %c0_4] : memref<1x128xf32, #tpu.memory_space<vmem>>, vector<1x128xf32>
    %4 = vector.broadcast %3 : vector<1x128xf32> to vector<240x128xf32>
    %5 = arith.addf %2, %4 : vector<240x128xf32>
    %cst_5 = arith.constant 0.000000e+00 : f32
    %6 = vector.broadcast %cst_5 : f32 to vector<240x128xf32>
    %7 = arith.maximumf %5, %6 : vector<240x128xf32>
    %c0_6 = arith.constant 0 : index
    %c0_7 = arith.constant 0 : index
    %8 = vector.load %arg4[%c0_6, %c0_7] : memref<128x128xf32, #tpu.memory_space<vmem>>, vector<128x128xf32>
    %cst_8 = arith.constant dense<0.000000e+00> : vector<240x128xf32>
    %9 = tpu.matmul %7, %8, %cst_8 {dimension_numbers = #tpu.dot_dimension_numbers<[1], [0], [0], [1], [0, 0, 1, 1], [], []>} : vector<240x128xf32>, vector<128x128xf32>, vector<240x128xf32> -> vector<240x128xf32>
    %10 = vector.extract_strided_slice %9 {offsets = [0, 0], sizes = [240, 2], strides = [1, 1]} : vector<240x128xf32> to vector<240x2xf32>
    %c0_9 = arith.constant 0 : index
    %c0_10 = arith.constant 0 : index
    %11 = vector.load %arg5[%c0_9, %c0_10] : memref<1x2xf32, #tpu.memory_space<vmem>>, vector<1x2xf32>
    %12 = vector.broadcast %11 : vector<1x2xf32> to vector<240x2xf32>
    %13 = arith.addf %10, %12 : vector<240x2xf32>
    %c0_11 = arith.constant 0 : index
    %c0_12 = arith.constant 0 : index
    %14 = vector.load %arg6[%c0_11, %c0_12] : memref<240x2xf32, #tpu.memory_space<vmem>>, vector<240x2xf32>
    tpu.vector_store %arg6[%c0_11, %c0_12], %13 {strides = array<i32>} : memref<240x2xf32, #tpu.memory_space<vmem>>, vector<240x2xf32>,
    return
  }
  func.func @transform_0(%arg0: i32) -> (i32, i32) {
    %c0_i32 = arith.constant 0 : i32
    %c0_i32_0 = arith.constant 0 : i32
    return %arg0, %c0_i32 : i32, i32
  }
  func.func @transform_1(%arg0: i32) -> (i32, i32) {
    %c0_i32 = arith.constant 0 : i32
    %c0_i32_0 = arith.constant 0 : i32
    %c0_i32_1 = arith.constant 0 : i32
    return %c0_i32, %c0_i32_0 : i32, i32
  }
  func.func @transform_2(%arg0: i32) -> (i32, i32) {
    %c0_i32 = arith.constant 0 : i32
    %c0_i32_0 = arith.constant 0 : i32
    %c0_i32_1 = arith.constant 0 : i32
    return %c0_i32, %c0_i32_0 : i32, i32
  }
  func.func @transform_3(%arg0: i32) -> (i32, i32) {
    %c0_i32 = arith.constant 0 : i32
    %c0_i32_0 = arith.constant 0 : i32
    %c0_i32_1 = arith.constant 0 : i32
    return %c0_i32, %c0_i32_0 : i32, i32
  }
  func.func @transform_4(%arg0: i32) -> (i32, i32) {
    %c0_i32 = arith.constant 0 : i32
    %c0_i32_0 = arith.constant 0 : i32
    %c0_i32_1 = arith.constant 0 : i32
    return %c0_i32, %c0_i32_0 : i32, i32
  }
  func.func @transform_5(%arg0: i32) -> (i32, i32) {
    %c0_i32 = arith.constant 0 : i32
    %c0_i32_0 = arith.constant 0 : i32
    return %arg0, %c0_i32 : i32, i32
  }
}

</mosaic_0001>

<bundles_post_ra>
// kernel: net1_forward.1
= control target key start
LH: loop header
LB: loop body
LE: loop exit
PB: predicated region body
PF: predicated region fallthrough
CT: control target
= control target key end

     0   :  { %s1322_s18 = smov 0   ;;  %s1608_s0 = inlined_call_operand.vmem [shape: f32[480,30], index: 0, kind: input, shape index: {}]   ;;  %s1609_s1 = inlined_call_operand.vmem [shape: f32[30,128], index: 1, kind: input, shape index: {}]   ;;  %s1610_s2 = inlined_call_operand.vmem [shape: f32[1,128], index: 2, kind: input, shape index: {}]   ;;  %s1611_s3 = inlined_call_operand.vmem [shape: f32[128,128], index: 3, kind: input, shape index: {}]   ;;  %s1612_s4 = inlined_call_operand.vmem [shape: f32[1,2], index: 4, kind: input, shape index: {}]   ;;  %s1613_s5 = inlined_call_operand.vmem [shape: f32[480,2], index: 5, kind: output, shape index: {}]  }
   0x1 LB: > { %s964_s19 = sadd.s32 4294967295, %s1289_s18   ;;  %p968_p0 = scmp.ge.s32.totalorder %s1289_s18, 1  ;;  %s1289_s18 = sphi %s1322_s18, %s15_s18  }
   0x2   : > { %p188_p1 = scmp.lt.s32.totalorder %s1289_s18, 3 }
   0x4   : > { %p189_p2 = pnand %p968_p0, %p188_p1 }
   0x5   : > { %v258_v0 = vld [vmem:[%s1609_s1] sm:$0xff] (!%p189_p2)  ;;  %v259_v1 = vld [vmem:[%s1609_s1 + $0x8] sm:$0xff] (!%p189_p2)  ;;  %v260_v2 = vld [vmem:[%s1609_s1 + $0x10] sm:$0xff] (!%p189_p2)  ;;  %vm360_vm0 = vcmask (!%p189_p2), 1045504   ;;  %s216_s26 = smul.u32 (!%p189_p2), 30, %s964_s19  ;;  %vm1291_vm1 = vmmov (!%p189_p2), 1  }
   0x6   : > { %192 = sbr.rel (%p189_p2) target bundleno = 508 (0x1fc), region = 40  ;;  %v1216_v3 = vpack.c.bf16 (!%p189_p2), %v259_v1, %v258_v0  ;;  %v261_v4 = vld [vmem:[%s1609_s1 + $0x18] sm:$0x3f] (!%p189_p2)  ;;  %vm1342_vm2 = vmpackc.low (!%p189_p2), %vm360_vm0, %vm1291_vm1  ;;  %v609_v6 = vld [vmem:[%s1611_s3] sm:$0xff] (!%p189_p2)  ;;  %vm269_vm3 = vcmask (!%p189_p2), 244736   ;;  %vm877_vm4 = vcmask (!%p189_p2), 15360  }
   0x7   : > { %v1220_v7 = vpack.c.bf16 (!%p189_p2), %v261_v4, %v260_v2  ;;  %p217_p3 = scmp.lt.s32.totalorder (!%p189_p2), %s216_s26, 59  ;;  %v610_v8 = vld [vmem:[%s1611_s3 + $0x8] sm:$0xff] (!%p189_p2)  ;;  %v611_v9 = vld [vmem:[%s1611_s3 + $0x10] sm:$0xff] (!%p189_p2)  ;;  %v612_v10 = vld [vmem:[%s1611_s3 + $0x18] sm:$0xff] (!%p189_p2) }
   0x8   : > { %1217 = vmatprep.subr.bf16.mxu0 (!%p189_p2), %v1216_v3  ;;  %v1226_v11 = vpack.c.bf16 (!%p189_p2), %v610_v8, %v609_v6  ;;  %v1230_v12 = vpack.c.bf16 (!%p189_p2), %v612_v10, %v611_v9  ;;  %v613_v13 = vld [vmem:[%s1611_s3 + $0x20] sm:$0xff] (!%p189_p2)  ;;  %v614_v14 = vld [vmem:[%s1611_s3 + $0x28] sm:$0xff] (!%p189_p2)  ;;  %v615_v19 = vld [vmem:[%s1611_s3 + $0x30] sm:$0xff] (!%p189_p2) }
   0x9   : > { %1219 = vmatpush3.bf16.msra.mxu0 (!%p189_p2), %v1216_v3  ;;  %v1234_v18 = vpack.c.bf16 (!%p189_p2), %v614_v14, %v613_v13  ;;  %v616_v20 = vld [vmem:[%s1611_s3 + $0x38] sm:$0xff] (!%p189_p2)  ;;  %v617_v24 = vld [vmem:[%s1611_s3 + $0x40] sm:$0xff] (!%p189_p2)  ;;  %v618_v25 = vld [vmem:[%s1611_s3 + $0x48] sm:$0xff] (!%p189_p2) }
   0xa   : > { %1222 = vmatprep.subr.msk.bf16.mxu0 (!%p189_p2), %vm1342_vm2, %v1220_v7  ;;  %1258 = vmatprep.subr.bf16.mxu1 (!%p189_p2), %v1226_v11  ;;  %v1238_v23 = vpack.c.bf16 (!%p189_p2), %v616_v20, %v615_v19  ;;  %v1242_v28 = vpack.c.bf16 (!%p189_p2), %v618_v25, %v617_v24  ;;  %v619_v29 = vld [vmem:[%s1611_s3 + $0x50] sm:$0xff] (!%p189_p2)  ;;  %v620_v30 = vld [vmem:[%s1611_s3 + $0x58] sm:$0xff] (!%p189_p2)  ;;  %v621_v34 = vld [vmem:[%s1611_s3 + $0x60] sm:$0xff] (!%p189_p2) }
   0xb   : > { %1266 = vmatpush3.bf16.msra.mxu1 (!%p189_p2), %v1226_v11  ;;  %v1246_v33 = vpack.c.bf16 (!%p189_p2), %v620_v30, %v619_v29  ;;  %v622_v35 = vld [vmem:[%s1611_s3 + $0x68] sm:$0xff] (!%p189_p2)  ;;  %v623_v58 = vld [vmem:[%s1611_s3 + $0x70] sm:$0xff] (!%p189_p2)  ;;  %v624_v59 = vld [vmem:[%s1611_s3 + $0x78] sm:$0xff] (!%p189_p2) }
   0xc   : > { %1259 = vmatprep.subr.bf16.mxu1 (!%p189_p2), %v1230_v12  ;;  %v1250_v38 = vpack.c.bf16 (!%p189_p2), %v622_v35, %v621_v34  ;;  %v1254_v60 = vpack.c.bf16 (!%p189_p2), %v624_v59, %v623_v58  ;;  %v1471_v61 = vld [vmem:[%s1610_s2] ss:$0 sm:$0xff] (!%p189_p2) }
   0xd   : > { %s1617_s26 = smov (!%p217_p3, %s216_s26), 59  ;;  %1225 = vmatpush3.bf16.msk.msra.mxu0 %vm1342_vm2, %v1220_v7 }
   0xe   : > { %s969_s12 = sshll.u32 %s1617_s26, 3  ;;  %1227 = vmatprep.subr.bf16.mxu0 %v1226_v11 }
   0xf   : > { %s1374_s20 = scalar_lea.vmem %s1608_s0, %s969_s12  ;;  %1267 = vmatpush3.bf16.msra.mxu1 %v1230_v12  ;;  %s1513_s25 = scalar_lea.vmem %s1613_s5, %s969_s12 }
  0x10   : > { %v228_v15 = vld [vmem:[%s1374_s20] sm:$0xff]  ;;  %v229_v16 = vld [vmem:[%s1374_s20 + $0x8] sm:$0xff]  ;;  %v230_v17 = vld [vmem:[%s1374_s20 + $0x10] sm:$0xff]  ;;  %1260 = vmatprep.subr.bf16.mxu1 %v1234_v18 }
  0x11   : > { %1094 = vmatprep.mubr.msk.f32.mxu0 %vm269_vm3, %v228_v15  ;;  %v231_v21 = vld [vmem:[%s1374_s20 + $0x18] sm:$0xff]  ;;  %v232_v22 = vld [vmem:[%s1374_s20 + $0x20] sm:$0xff]  ;;  %v233_v26 = vld [vmem:[%s1374_s20 + $0x28] sm:$0xff] }
  0x12   : > { %1095 = vmatmul.mubr.msk.f32.vlgmr.msra.gmra.mrb[0].mxu0 %vm269_vm3, %v229_v16  ;;  %v234_v27 = vld [vmem:[%s1374_s20 + $0x30] sm:$0xff]  ;;  %v235_v31 = vld [vmem:[%s1374_s20 + $0x38] sm:$0xff]  ;;  %v236_v32 = vld [vmem:[%s1374_s20 + $0x40] sm:$0xff] }
  0x13   : > { %1097 = vmatprep.mubr.msk.f32.mxu0 %vm269_vm3, %v230_v17  ;;  %1229 = vmatpush3.bf16.msra.mxu0 %v1226_v11  ;;  %v237_v36 = vld [vmem:[%s1374_s20 + $0x48] sm:$0xff]  ;;  %v238_v37 = vld [vmem:[%s1374_s20 + $0x50] sm:$0xff]  ;;  %v239_v39 = vld [vmem:[%s1374_s20 + $0x58] sm:$0xff] }
  0x14   : > { %1231 = vmatprep.subr.bf16.mxu0 %v1230_v12  ;;  %1268 = vmatpush3.bf16.msra.mxu1 %v1234_v18  ;;  %v240_v40 = vld [vmem:[%s1374_s20 + $0x60] sm:$0xff]  ;;  %v241_v41 = vld [vmem:[%s1374_s20 + $0x68] sm:$0xff]  ;;  %v242_v42 = vld [vmem:[%s1374_s20 + $0x70] sm:$0xff] }
  0x15   : > { %1261 = vmatprep.subr.bf16.mxu1 %v1238_v23  ;;  %v243_v43 = vld [vmem:[%s1374_s20 + $0x78] sm:$0xff]  ;;  %v244_v44 = vld [vmem:[%s1374_s20 + $0x80] sm:$0xff]  ;;  %v245_v45 = vld [vmem:[%s1374_s20 + $0x88] sm:$0xff] }
  0x16   : > { %1098 = vmatmul.mubr.msk.f32.gmra.mrb[2].mxu0 %vm269_vm3, %v231_v21  ;;  %v246_v46 = vld [vmem:[%s1374_s20 + $0x90] sm:$0xff]  ;;  %v247_v47 = vld [vmem:[%s1374_s20 + $0x98] sm:$0xff]  ;;  %v248_v48 = vld [vmem:[%s1374_s20 + $0xa0] sm:$0xff] }
  0x17   : > { %1100 = vmatprep.mubr.msk.f32.mxu0 %vm269_vm3, %v232_v22  ;;  %1233 = vmatpush3.bf16.msra.mxu0 %v1230_v12  ;;  %v249_v49 = vld [vmem:[%s1374_s20 + $0xa8] sm:$0xff]  ;;  %v250_v50 = vld [vmem:[%s1374_s20 + $0xb0] sm:$0xff]  ;;  %v251_v51 = vld [vmem:[%s1374_s20 + $0xb8] sm:$0xff] }
  0x18   : > { %1235 = vmatprep.subr.bf16.mxu0 %v1234_v18  ;;  %1269 = vmatpush3.bf16.msra.mxu1 %v1238_v23  ;;  %v252_v52 = vld [vmem:[%s1374_s20 + $0xc0] sm:$0xff]  ;;  %v253_v53 = vld [vmem:[%s1374_s20 + $0xc8] sm:$0xff]  ;;  %v254_v54 = vld [vmem:[%s1374_s20 + $0xd0] sm:$0xff] }
  0x19   : > { %1262 = vmatprep.subr.bf16.mxu1 %v1242_v28  ;;  %v255_v55 = vld [vmem:[%s1374_s20 + $0xd8] sm:$0xff]  ;;  %v256_v56 = vld [vmem:[%s1374_s20 + $0xe0] sm:$0xff]  ;;  %v257_v57 = vld [vmem:[%s1374_s20 + $0xe8] sm:$0xff] }
  0x1a   : > { %1101 = vmatmul.mubr.msk.f32.gmra.mrb[4].mxu0 %vm269_vm3, %v233_v26 }
  0x1b   : > { %1103 = vmatprep.mubr.msk.f32.mxu0 %vm269_vm3, %v234_v27  ;;  %1237 = vmatpush3.bf16.msra.mxu0 %v1234_v18 }
  0x1c   : > { %1239 = vmatprep.subr.bf16.mxu0 %v1238_v23  ;;  %1270 = vmatpush3.bf16.msra.mxu1 %v1242_v28 }
  0x1d   : > { %1263 = vmatprep.subr.bf16.mxu1 %v1246_v33 }
  0x1e   : > { %1104 = vmatmul.mubr.msk.f32.gmra.mrb[6].mxu0 %vm269_vm3, %v235_v31 }
  0x1f   : > { %1106 = vmatprep.mubr.msk.f32.mxu0 %vm269_vm3, %v236_v32  ;;  %1241 = vmatpush3.bf16.msra.mxu0 %v1238_v23 }
  0x20   : > { %1243 = vmatprep.subr.bf16.mxu0 %v1242_v28  ;;  %1271 = vmatpush3.bf16.msra.mxu1 %v1246_v33 }
  0x21   : > { %1264 = vmatprep.subr.bf16.mxu1 %v1250_v38 }
  0x22   : > { %1107 = vmatmul.mubr.msk.f32.gmra.mrb[8].mxu0 %vm269_vm3, %v237_v36 }
  0x23   : > { %1109 = vmatprep.mubr.msk.f32.mxu0 %vm269_vm3, %v238_v37  ;;  %1245 = vmatpush3.bf16.msra.mxu0 %v1242_v28 }
  0x24   : > { %1247 = vmatprep.subr.bf16.mxu0 %v1246_v33  ;;  %1272 = vmatpush3.bf16.msra.mxu1 %v1250_v38 }
  0x25   : > { %1265 = vmatprep.subr.bf16.mxu1 %v1254_v60 }
  0x26   : > { %1110 = vmatmul.mubr.msk.f32.gmra.mrb[10].mxu0 %vm269_vm3, %v239_v39 }
  0x27   : > { %1112 = vmatprep.mubr.msk.f32.mxu0 %vm269_vm3, %v240_v40  ;;  %1249 = vmatpush3.bf16.msra.mxu0 %v1246_v33 }
  0x28   : > { %1251 = vmatprep.subr.bf16.mxu0 %v1250_v38  ;;  %1273 = vmatpush3.bf16.msra.mxu1 %v1254_v60 }
  0x2a   : > { %1113 = vmatmul.mubr.msk.f32.gmra.mrb[12].mxu0 %vm269_vm3, %v241_v41 }
  0x2b   : > { %1115 = vmatprep.mubr.msk.f32.mxu0 %vm269_vm3, %v242_v42  ;;  %1253 = vmatpush3.bf16.msra.mxu0 %v1250_v38 }
  0x2c   : > { %1255 = vmatprep.subr.bf16.mxu0 %v1254_v60 }
  0x2e   : > { %1116 = vmatmul.mubr.msk.f32.gmra.mrb[14].mxu0 %vm269_vm3, %v243_v43 }
  0x2f   : > { %1118 = vmatprep.mubr.msk.f32.mxu0 %vm269_vm3, %v244_v44  ;;  %1257 = vmatpush3.bf16.msra.mxu0 %v1254_v60 }
  0x32   : > { %1119 = vmatmul.mubr.msk.f32.gmra.mrb[16].mxu0 %vm269_vm3, %v245_v45 }
  0x33   : > { %1121 = vmatprep.mubr.msk.f32.mxu0 %vm269_vm3, %v246_v46 }
  0x36   : > { %1122 = vmatmul.mubr.msk.f32.gmra.mrb[18].mxu0 %vm269_vm3, %v247_v47 }
  0x37   : > { %1124 = vmatprep.mubr.msk.f32.mxu0 %vm269_vm3, %v248_v48 }
  0x3a   : > { %1125 = vmatmul.mubr.msk.f32.gmra.mrb[20].mxu0 %vm269_vm3, %v249_v49 }
  0x3b   : > { %1127 = vmatprep.mubr.msk.f32.mxu0 %vm269_vm3, %v250_v50 }
  0x3e   : > { %1128 = vmatmul.mubr.msk.f32.gmra.mrb[22].mxu0 %vm269_vm3, %v251_v51 }
  0x3f   : > { %1130 = vmatprep.mubr.msk.f32.mxu0 %vm269_vm3, %v252_v52 }
  0x42   : > { %1131 = vmatmul.mubr.msk.f32.gmra.mrb[24].mxu0 %vm269_vm3, %v253_v53 }
  0x43   : > { %1133 = vmatprep.mubr.msk.f32.mxu0 %vm269_vm3, %v254_v54 }
  0x46   : > { %1134 = vmatmul.mubr.msk.f32.gmra.mrb[26].mxu0 %vm269_vm3, %v255_v55 }
  0x47   : > { %1136 = vmatprep.mubr.msk.f32.mxu0 %vm269_vm3, %v256_v56 }
  0x4a   : > { %1137 = vmatmul.mubr.msk.f32.gmra.mrb[28].mxu0 %vm269_vm3, %v257_v57 }
  0xe5   : > { %v1096_v62 = vpop.f32.mrb[0].mxu0 }
  0xe6   : > { %v436_v63 = vadd.f32 %v1096_v62, %v1471_v61  ;;  %v430_v0 = vpop.f32.mrb[1].mxu0 }
  0xe7   : > { %v431_v1 = vadd.f32 %v1471_v61, %v430_v0 }
  0xe8   : > { %v580_v4 = vmax.f32 %v436_v63, 0.0 }
  0xe9   : > { %v579_v2 = vmax.f32 %v431_v1, 0.0  ;;  %v1099_v3 = vpop.f32.mrb[2].mxu0 }
  0xea   : > { %v446_v5 = vadd.f32 %v1099_v3, %v1471_v61  ;;  %v440_v6 = vpop.f32.mrb[3].mxu0 }
  0xeb   : > { %v441_v7 = vadd.f32 %v1471_v61, %v440_v6  ;;  %1171 = vmatprep.mubr.f32.mxu0 %v579_v2 }
  0xec   : > { %1172 = vmatmul.mubr.f32.vlgmr.msra.gmra.mrb[30].mxu0 %v580_v4  ;;  %v582_v10 = vmax.f32 %v446_v5, 0.0 }
  0xed   : > { %v581_v8 = vmax.f32 %v441_v7, 0.0  ;;  %v1102_v9 = vpop.f32.mrb[4].mxu0 }
  0xee   : > { %v456_v11 = vadd.f32 %v1102_v9, %v1471_v61  ;;  %v450_v12 = vpop.f32.mrb[5].mxu0 }
  0xef   : > { %v451_v13 = vadd.f32 %v1471_v61, %v450_v12  ;;  %1174 = vmatprep.mubr.f32.mxu0 %v581_v8 }
  0xf0   : > { %1175 = vmatmul.mubr.f32.gmra.mrb[32].mxu0 %v582_v10  ;;  %v584_v16 = vmax.f32 %v456_v11, 0.0 }
  0xf1   : > { %v583_v14 = vmax.f32 %v451_v13, 0.0  ;;  %v1105_v15 = vpop.f32.mrb[6].mxu0 }
  0xf2   : > { %v466_v17 = vadd.f32 %v1105_v15, %v1471_v61  ;;  %v460_v18 = vpop.f32.mrb[7].mxu0 }
  0xf3   : > { %1177 = vmatprep.mubr.f32.mxu0 %v583_v14  ;;  %v461_v19 = vadd.f32 %v1471_v61, %v460_v18 }
  0xf4   : > { %1178 = vmatmul.mubr.f32.gmra.mrb[34].mxu0 %v584_v16  ;;  %v586_v22 = vmax.f32 %v466_v17, 0.0 }
  0xf5   : > { %v1108_v20 = vpop.f32.mrb[8].mxu0  ;;  %v585_v21 = vmax.f32 %v461_v19, 0.0 }
  0xf6   : > { %v476_v23 = vadd.f32 %v1108_v20, %v1471_v61  ;;  %v470_v24 = vpop.f32.mrb[9].mxu0 }
  0xf7   : > { %v471_v25 = vadd.f32 %v1471_v61, %v470_v24  ;;  %1180 = vmatprep.mubr.f32.mxu1 %v585_v21 }
  0xf8   : > { %1181 = vmatmul.mubr.f32.vlgmr.msra.gmra.mrb[0].mxu1 %v586_v22  ;;  %v588_v28 = vmax.f32 %v476_v23, 0.0 }
  0xf9   : > { %v587_v26 = vmax.f32 %v471_v25, 0.0  ;;  %v1111_v27 = vpop.f32.mrb[10].mxu0  ;;  %v1506_v25 = vld [vmem:[%s1612_s4] ss:$0 sm:$0xff] }
  0xfa   : > { %v486_v29 = vadd.f32 %v1111_v27, %v1471_v61  ;;  %v480_v30 = vpop.f32.mrb[11].mxu0 }
  0xfb   : > { %v481_v31 = vadd.f32 %v1471_v61, %v480_v30  ;;  %1183 = vmatprep.mubr.f32.mxu1 %v587_v26 }
  0xfc   : > { %1184 = vmatmul.mubr.f32.gmra.mrb[2].mxu1 %v588_v28  ;;  %v590_v34 = vmax.f32 %v486_v29, 0.0 }
  0xfd   : > { %v589_v32 = vmax.f32 %v481_v31, 0.0  ;;  %v1114_v33 = vpop.f32.mrb[12].mxu0 }
  0xfe   : > { %v496_v35 = vadd.f32 %v1114_v33, %v1471_v61  ;;  %v490_v36 = vpop.f32.mrb[13].mxu0 }
  0xff   : > { %v491_v37 = vadd.f32 %v1471_v61, %v490_v36  ;;  %1186 = vmatprep.mubr.f32.mxu1 %v589_v32 }
 0x100   : > { %1187 = vmatmul.mubr.f32.gmra.mrb[4].mxu1 %v590_v34  ;;  %v592_v40 = vmax.f32 %v496_v35, 0.0 }
 0x101   : > { %v591_v38 = vmax.f32 %v491_v37, 0.0  ;;  %v1117_v39 = vpop.f32.mrb[14].mxu0 }
 0x102   : > { %v506_v41 = vadd.f32 %v1117_v39, %v1471_v61  ;;  %v500_v42 = vpop.f32.mrb[15].mxu0 }
 0x103   : > { %v501_v43 = vadd.f32 %v1471_v61, %v500_v42  ;;  %1189 = vmatprep.mubr.f32.mxu1 %v591_v38 }
 0x104   : > { %1190 = vmatmul.mubr.f32.gmra.mrb[6].mxu1 %v592_v40  ;;  %v594_v46 = vmax.f32 %v506_v41, 0.0 }
 0x105   : > { %v593_v44 = vmax.f32 %v501_v43, 0.0  ;;  %v1120_v45 = vpop.f32.mrb[16].mxu0 }
 0x106   : > { %v516_v47 = vadd.f32 %v1120_v45, %v1471_v61  ;;  %v510_v48 = vpop.f32.mrb[17].mxu0 }
 0x107   : > { %v511_v49 = vadd.f32 %v1471_v61, %v510_v48  ;;  %1192 = vmatprep.mubr.f32.mxu1 %v593_v44 }
 0x108   : > { %1193 = vmatmul.mubr.f32.gmra.mrb[8].mxu1 %v594_v46  ;;  %v596_v52 = vmax.f32 %v516_v47, 0.0 }
 0x109   : > { %v595_v50 = vmax.f32 %v511_v49, 0.0  ;;  %v1123_v51 = vpop.f32.mrb[18].mxu0 }
 0x10a   : > { %v526_v53 = vadd.f32 %v1123_v51, %v1471_v61  ;;  %v520_v54 = vpop.f32.mrb[19].mxu0 }
 0x10b   : > { %v521_v55 = vadd.f32 %v1471_v61, %v520_v54  ;;  %1195 = vmatprep.mubr.f32.mxu1 %v595_v50 }
 0x10c   : > { %1196 = vmatmul.mubr.f32.gmra.mrb[10].mxu1 %v596_v52  ;;  %v598_v58 = vmax.f32 %v526_v53, 0.0 }
 0x10d   : > { %v597_v56 = vmax.f32 %v521_v55, 0.0  ;;  %v1126_v57 = vpop.f32.mrb[20].mxu0 }
 0x10e   : > { %v536_v59 = vadd.f32 %v1126_v57, %v1471_v61  ;;  %v530_v60 = vpop.f32.mrb[21].mxu0 }
 0x10f   : > { %v531_v62 = vadd.f32 %v1471_v61, %v530_v60  ;;  %1198 = vmatprep.mubr.f32.mxu1 %v597_v56 }
 0x110   : > { %1199 = vmatmul.mubr.f32.gmra.mrb[12].mxu1 %v598_v58  ;;  %v600_v1 = vmax.f32 %v536_v59, 0.0 }
 0x111   : > { %v599_v63 = vmax.f32 %v531_v62, 0.0  ;;  %v1129_v0 = vpop.f32.mrb[22].mxu0 }
 0x112   : > { %v546_v2 = vadd.f32 %v1129_v0, %v1471_v61  ;;  %v540_v3 = vpop.f32.mrb[23].mxu0 }
 0x113   : > { %v541_v4 = vadd.f32 %v1471_v61, %v540_v3  ;;  %1201 = vmatprep.mubr.f32.mxu1 %v599_v63 }
 0x114   : > { %1202 = vmatmul.mubr.f32.gmra.mrb[14].mxu1 %v600_v1  ;;  %v602_v7 = vmax.f32 %v546_v2, 0.0 }
 0x115   : > { %v601_v5 = vmax.f32 %v541_v4, 0.0  ;;  %v1132_v6 = vpop.f32.mrb[24].mxu0 }
 0x116   : > { %v556_v8 = vadd.f32 %v1132_v6, %v1471_v61  ;;  %v550_v9 = vpop.f32.mrb[25].mxu0 }
 0x117   : > { %v551_v10 = vadd.f32 %v1471_v61, %v550_v9  ;;  %1204 = vmatprep.mubr.f32.mxu1 %v601_v5 }
 0x118   : > { %1205 = vmatmul.mubr.f32.gmra.mrb[16].mxu1 %v602_v7  ;;  %v604_v13 = vmax.f32 %v556_v8, 0.0 }
 0x119   : > { %v603_v11 = vmax.f32 %v551_v10, 0.0  ;;  %v1135_v12 = vpop.f32.mrb[26].mxu0 }
 0x11a   : > { %v566_v14 = vadd.f32 %v1135_v12, %v1471_v61  ;;  %v560_v15 = vpop.f32.mrb[27].mxu0 }
 0x11b   : > { %v561_v16 = vadd.f32 %v1471_v61, %v560_v15  ;;  %1207 = vmatprep.mubr.f32.mxu1 %v603_v11 }
 0x11c   : > { %1208 = vmatmul.mubr.f32.gmra.mrb[18].mxu1 %v604_v13  ;;  %v606_v19 = vmax.f32 %v566_v14, 0.0 }
 0x11d   : > { %v605_v17 = vmax.f32 %v561_v16, 0.0  ;;  %v1138_v18 = vpop.f32.mrb[28].mxu0 }
 0x11e   : > { %v576_v20 = vadd.f32 %v1138_v18, %v1471_v61  ;;  %v570_v21 = vpop.f32.mrb[29].mxu0 }
 0x11f   : > { %v571_v22 = vadd.f32 %v1471_v61, %v570_v21  ;;  %1210 = vmatprep.mubr.f32.mxu1 %v605_v17 }
 0x120   : > { %1211 = vmatmul.mubr.f32.gmra.mrb[20].mxu1 %v606_v19  ;;  %v608_v24 = vmax.f32 %v576_v20, 0.0 }
 0x121   : > { %v607_v23 = vmax.f32 %v571_v22, 0.0 }
 0x123   : > { %1213 = vmatprep.mubr.f32.mxu1 %v607_v23 }
 0x124   : > { %1214 = vmatmul.mubr.f32.gmra.mrb[22].mxu1 %v608_v24 }
 0x1bf   : > { %v1173_v61 = vpop.f32.mrb[30].mxu0 }
 0x1c0   : > { %v848_v26 = vadd.f32 %v1173_v61, %v1506_v25  ;;  %v691_v27 = vpop.f32.mrb[31].mxu0 }
 0x1c1   : > { %v847_v28 = vadd.f32 %v1506_v25, %v691_v27 }
 0x1c2   : > { %879 = vst.msk [vmem:[%s1513_s25 + $0x8] sm:$0xff] %vm877_vm4, %v848_v26 }
 0x1c3   : > { %878 = vst.msk [vmem:[%s1513_s25] sm:$0xff] %vm877_vm4, %v847_v28  ;;  %v1176_v29 = vpop.f32.mrb[32].mxu0 }
 0x1c4   : > { %v850_v30 = vadd.f32 %v1176_v29, %v1506_v25  ;;  %v701_v31 = vpop.f32.mrb[33].mxu0 }
 0x1c5   : > { %v849_v32 = vadd.f32 %v1506_v25, %v701_v31 }
 0x1c6   : > { %881 = vst.msk [vmem:[%s1513_s25 + $0x18] sm:$0xff] %vm877_vm4, %v850_v30 }
 0x1c7   : > { %880 = vst.msk [vmem:[%s1513_s25 + $0x10] sm:$0xff] %vm877_vm4, %v849_v32  ;;  %v1179_v33 = vpop.f32.mrb[34].mxu0 }
 0x1c8   : > { %v852_v34 = vadd.f32 %v1179_v33, %v1506_v25  ;;  %v711_v35 = vpop.f32.mrb[35].mxu0 }
 0x1c9   : > { %v851_v36 = vadd.f32 %v1506_v25, %v711_v35 }
 0x1ca   : > { %883 = vst.msk [vmem:[%s1513_s25 + $0x28] sm:$0xff] %vm877_vm4, %v852_v34 }
 0x1cb   : > { %882 = vst.msk [vmem:[%s1513_s25 + $0x20] sm:$0xff] %vm877_vm4, %v851_v36  ;;  %v1182_v37 = vpop.f32.mrb[0].mxu1 }
 0x1cc   : > { %v854_v38 = vadd.f32 %v1182_v37, %v1506_v25  ;;  %v721_v39 = vpop.f32.mrb[1].mxu1 }
 0x1cd   : > { %v853_v40 = vadd.f32 %v1506_v25, %v721_v39 }
 0x1ce   : > { %885 = vst.msk [vmem:[%s1513_s25 + $0x38] sm:$0xff] %vm877_vm4, %v854_v38 }
 0x1cf   : > { %884 = vst.msk [vmem:[%s1513_s25 + $0x30] sm:$0xff] %vm877_vm4, %v853_v40  ;;  %v1185_v41 = vpop.f32.mrb[2].mxu1 }
 0x1d0   : > { %v856_v42 = vadd.f32 %v1185_v41, %v1506_v25  ;;  %v731_v43 = vpop.f32.mrb[3].mxu1 }
 0x1d1   : > { %v855_v44 = vadd.f32 %v1506_v25, %v731_v43 }
 0x1d2   : > { %887 = vst.msk [vmem:[%s1513_s25 + $0x48] sm:$0xff] %vm877_vm4, %v856_v42 }
 0x1d3   : > { %886 = vst.msk [vmem:[%s1513_s25 + $0x40] sm:$0xff] %vm877_vm4, %v855_v44  ;;  %v1188_v45 = vpop.f32.mrb[4].mxu1 }
 0x1d4   : > { %v858_v46 = vadd.f32 %v1188_v45, %v1506_v25  ;;  %v741_v47 = vpop.f32.mrb[5].mxu1 }
 0x1d5   : > { %v857_v48 = vadd.f32 %v1506_v25, %v741_v47 }
 0x1d6   : > { %889 = vst.msk [vmem:[%s1513_s25 + $0x58] sm:$0xff] %vm877_vm4, %v858_v46 }
 0x1d7   : > { %888 = vst.msk [vmem:[%s1513_s25 + $0x50] sm:$0xff] %vm877_vm4, %v857_v48  ;;  %v1191_v49 = vpop.f32.mrb[6].mxu1 }
 0x1d8   : > { %v860_v50 = vadd.f32 %v1191_v49, %v1506_v25  ;;  %v751_v51 = vpop.f32.mrb[7].mxu1 }
 0x1d9   : > { %v859_v52 = vadd.f32 %v1506_v25, %v751_v51 }
 0x1da   : > { %891 = vst.msk [vmem:[%s1513_s25 + $0x68] sm:$0xff] %vm877_vm4, %v860_v50 }
 0x1db   : > { %890 = vst.msk [vmem:[%s1513_s25 + $0x60] sm:$0xff] %vm877_vm4, %v859_v52  ;;  %v1194_v53 = vpop.f32.mrb[8].mxu1 }
 0x1dc   : > { %v862_v54 = vadd.f32 %v1194_v53, %v1506_v25  ;;  %v761_v55 = vpop.f32.mrb[9].mxu1 }
 0x1dd   : > { %v861_v56 = vadd.f32 %v1506_v25, %v761_v55 }
 0x1de   : > { %893 = vst.msk [vmem:[%s1513_s25 + $0x78] sm:$0xff] %vm877_vm4, %v862_v54 }
 0x1df   : > { %892 = vst.msk [vmem:[%s1513_s25 + $0x70] sm:$0xff] %vm877_vm4, %v861_v56  ;;  %v1197_v57 = vpop.f32.mrb[10].mxu1 }
 0x1e0   : > { %v864_v58 = vadd.f32 %v1197_v57, %v1506_v25  ;;  %v771_v59 = vpop.f32.mrb[11].mxu1 }
 0x1e1   : > { %v863_v60 = vadd.f32 %v1506_v25, %v771_v59 }
 0x1e2   : > { %895 = vst.msk [vmem:[%s1513_s25 + $0x88] sm:$0xff] %vm877_vm4, %v864_v58 }
 0x1e3   : > { %894 = vst.msk [vmem:[%s1513_s25 + $0x80] sm:$0xff] %vm877_vm4, %v863_v60  ;;  %v1200_v62 = vpop.f32.mrb[12].mxu1 }
 0x1e4   : > { %v866_v63 = vadd.f32 %v1200_v62, %v1506_v25  ;;  %v781_v0 = vpop.f32.mrb[13].mxu1 }
 0x1e5   : > { %v865_v1 = vadd.f32 %v1506_v25, %v781_v0 }
 0x1e6   : > { %897 = vst.msk [vmem:[%s1513_s25 + $0x98] sm:$0xff] %vm877_vm4, %v866_v63 }
 0x1e7   : > { %896 = vst.msk [vmem:[%s1513_s25 + $0x90] sm:$0xff] %vm877_vm4, %v865_v1  ;;  %v1203_v2 = vpop.f32.mrb[14].mxu1 }
 0x1e8   : > { %v868_v3 = vadd.f32 %v1203_v2, %v1506_v25  ;;  %v791_v4 = vpop.f32.mrb[15].mxu1 }
 0x1e9   : > { %v867_v5 = vadd.f32 %v1506_v25, %v791_v4 }
 0x1ea   : > { %899 = vst.msk [vmem:[%s1513_s25 + $0xa8] sm:$0xff] %vm877_vm4, %v868_v3 }
 0x1eb   : > { %898 = vst.msk [vmem:[%s1513_s25 + $0xa0] sm:$0xff] %vm877_vm4, %v867_v5  ;;  %v1206_v6 = vpop.f32.mrb[16].mxu1 }
 0x1ec   : > { %v870_v7 = vadd.f32 %v1206_v6, %v1506_v25  ;;  %v801_v8 = vpop.f32.mrb[17].mxu1 }
 0x1ed   : > { %v869_v9 = vadd.f32 %v1506_v25, %v801_v8 }
 0x1ee   : > { %901 = vst.msk [vmem:[%s1513_s25 + $0xb8] sm:$0xff] %vm877_vm4, %v870_v7 }
 0x1ef   : > { %900 = vst.msk [vmem:[%s1513_s25 + $0xb0] sm:$0xff] %vm877_vm4, %v869_v9  ;;  %v1209_v10 = vpop.f32.mrb[18].mxu1 }
 0x1f0   : > { %v872_v11 = vadd.f32 %v1209_v10, %v1506_v25  ;;  %v811_v12 = vpop.f32.mrb[19].mxu1 }
 0x1f1   : > { %v871_v13 = vadd.f32 %v1506_v25, %v811_v12 }
 0x1f2   : > { %903 = vst.msk [vmem:[%s1513_s25 + $0xc8] sm:$0xff] %vm877_vm4, %v872_v11 }
 0x1f3   : > { %902 = vst.msk [vmem:[%s1513_s25 + $0xc0] sm:$0xff] %vm877_vm4, %v871_v13  ;;  %v1212_v14 = vpop.f32.mrb[20].mxu1 }
 0x1f4   : > { %v874_v15 = vadd.f32 %v1212_v14, %v1506_v25  ;;  %v821_v16 = vpop.f32.mrb[21].mxu1 }
 0x1f5   : > { %v873_v17 = vadd.f32 %v1506_v25, %v821_v16 }
 0x1f6   : > { %905 = vst.msk [vmem:[%s1513_s25 + $0xd8] sm:$0xff] %vm877_vm4, %v874_v15 }
 0x1f7   : > { %904 = vst.msk [vmem:[%s1513_s25 + $0xd0] sm:$0xff] %vm877_vm4, %v873_v17  ;;  %v1215_v18 = vpop.f32.mrb[22].mxu1 }
 0x1f8   : > { %v876_v19 = vadd.f32 %v1215_v18, %v1506_v25  ;;  %v831_v20 = vpop.f32.mrb[23].mxu1 }
 0x1f9   : > { %v875_v21 = vadd.f32 %v1506_v25, %v831_v20 }
 0x1fa   : > { %907 = vst.msk [vmem:[%s1513_s25 + $0xe8] sm:$0xff] %vm877_vm4, %v876_v19 }
 0x1fb   : > { %906 = vst.msk [vmem:[%s1513_s25 + $0xe0] sm:$0xff] %vm877_vm4, %v875_v21 }
 0x1fc PF: > { %s15_s18 = sadd.s32 1, %s1289_s18  }
 0x1fd   : > { %p12_p4 = scmp.ge.s32.totalorder %s15_s18, 4  }
 0x1ff   :  { %14 = sbr.rel (!%p12_p4) target bundleno = 1 (0x1), region = 70 }

</bundles_post_ra>
